<compile_context>
chip_gen: v7x
topology: tpu7x:2x2x1
jax: 0.10.0
libtpu: 0.0.40
codegen_flags: <defaults>
</compile_context>

<pallas_src>
import jax
import jax.numpy as jnp
from jax.experimental import pallas as pl
from jax.experimental.pallas import tpu as pltpu


def _round_up(x, m):
    return ((x + m - 1) // m) * m


def _fusion_fc_kernel(xb_ref, xe_ref, wt_ref, wb_ref, b_ref, o_ref):
    # xb_ref/xe_ref: (tm, K) activation halves
    # wt_ref/wb_ref: (K, N) weight halves (VMEM-resident, constant block index)
    # b_ref:         (8, N) bias broadcast onto a full (8,128) tile
    # o_ref:         (tm, N)
    # Fused concat: [xb | xe] @ [wt ; wb] == xb @ wt + xe @ wb.
    acc = jnp.dot(xb_ref[...], wt_ref[...], preferred_element_type=jnp.float32)
    acc = acc + jnp.dot(xe_ref[...], wb_ref[...], preferred_element_type=jnp.float32)
    o_ref[...] = (acc + b_ref[:1, :]).astype(o_ref.dtype)


def color_fusion_fc1(xb, xe, w, b, *, tm=1024, min_pallas_rows=64,
                     compute_dtype=None):
    """y = concat([xb, xe], axis=-1) @ w + b with the concat fused into the kernel.

    xb, xe : (M, K)      -- the two halves of the concatenated features
    w      : (2*K, N)    -- transpose of PyTorch's (N, 2*K) Linear weight
    b      : (N,)
    Arbitrary M is supported: the partial trailing block is masked by Pallas
    (no padding copies, no output slice).
    """
    M, K = xb.shape
    assert xe.shape == (M, K)
    N = w.shape[1]
    assert w.shape[0] == 2 * K and b.shape == (N,)

    out_dtype = xb.dtype
    wt = w[:K]          # top half of the weight  (for the "base" features)
    wb = w[K:]          # bottom half             (for the "expert" features)

    if compute_dtype is not None:
        xb = xb.astype(compute_dtype)
        xe = xe.astype(compute_dtype)
        wt = wt.astype(compute_dtype)
        wb = wb.astype(compute_dtype)

    # --- small-M fast path ---------------------------------------------------
    # For a handful of rows the fixed pallas_call / pipeline setup dwarfs the
    # actual work; XLA fuses the two dots + bias fine at this size.
    if M < min_pallas_rows:
        y = (jnp.dot(xb, wt, preferred_element_type=jnp.float32)
             + jnp.dot(xe, wb, preferred_element_type=jnp.float32)
             + b.reshape(1, N))
        return y.astype(out_dtype)

    # --- row-tile selection ---------------------------------------------------
    # Big tiles amortize the ~0.35 us/step overhead; balance them across steps
    # so ragged M doesn't leave a tiny trailing tile (M=1050 -> 2x528, not
    # 1024 + 26).  Sublane alignment: 8 rows for f32, 16 for bf16 packing.
    row_align = 16 if xb.dtype == jnp.bfloat16 else 8
    n_steps = pl.cdiv(M, tm)
    tm_eff = _round_up(pl.cdiv(M, n_steps), row_align)
    grid = pl.cdiv(M, tm_eff)

    # Bias pre-broadcast to a full (8, 128) tile -> unmasked load.
    b8 = jnp.broadcast_to(b.reshape(1, N), (8, N)).astype(jnp.float32)

    cost = pl.CostEstimate(
        flops=2 * M * (2 * K) * N,
        transcendentals=0,
        bytes_accessed=(xb.dtype.itemsize * 2 * M * K     # both activation halves
                        + wt.dtype.itemsize * 2 * K * N   # both weight halves
                        + 4 * 8 * N                       # bias tile
                        + jnp.dtype(out_dtype).itemsize * M * N),
    )

    return pl.pallas_call(
        _fusion_fc_kernel,
        out_shape=jax.ShapeDtypeStruct((M, N), out_dtype),
        grid_spec=pltpu.PrefetchScalarGridSpec(
            num_scalar_prefetch=0,
            grid=(grid,),
            in_specs=[
                pl.BlockSpec((tm_eff, K), lambda i: (i, 0)),   # xb tile
                pl.BlockSpec((tm_eff, K), lambda i: (i, 0)),   # xe tile
                pl.BlockSpec((K, N), lambda i: (0, 0)),        # wt (VMEM-resident)
                pl.BlockSpec((K, N), lambda i: (0, 0)),        # wb (VMEM-resident)
                pl.BlockSpec((8, N), lambda i: (0, 0)),        # bias tile
            ],
            out_specs=pl.BlockSpec((tm_eff, N), lambda i: (i, 0)),
        ),
        compiler_params=pltpu.CompilerParams(
            dimension_semantics=("parallel",),
        ),
        cost_estimate=cost,
    )(xb, xe, wt, wb, b8)


def color_model_linear_forward(preds_semantics_base, preds_color_base,
                               preds_color_expert, w, b, *, tm=1024,
                               compute_dtype=None):
    """JAX/Pallas equivalent of ColorModelLinear.forward.

    The torch.cat is fused into the kernel (two dots against split weight
    halves); only free reshapes happen at the JAX level.
    """
    samples, channels, num_bins = preds_color_base.shape
    xb = preds_color_base.reshape(samples * channels, num_bins)
    xe = preds_color_expert.reshape(samples * channels, num_bins)
    y = color_fusion_fc1(xb, xe, w, b, tm=tm, compute_dtype=compute_dtype)
    y = y.reshape(samples, channels, -1)
    return preds_semantics_base, y


def _reference(preds_color_base, preds_color_expert, w, b):
    x = jnp.concatenate([preds_color_base, preds_color_expert], axis=-1)
    s, c, k = x.shape
    return (x.reshape(s * c, k) @ w + b).reshape(s, c, -1)


if __name__ == "__main__":
    num_bins = 128
    num_classes = 16

    key = jax.random.PRNGKey(0)
    (k_sem, k_base, k_exp, k_w, k_b,
     k_b2, k_e2, k_b3, k_e3) = jax.random.split(key, 9)

    # Deterministic parameter init matching nn.Linear(num_bins*2, num_bins):
    # PyTorch weight is (out, in) = (num_bins, 2*num_bins); we store its transpose.
    fan_in = 2 * num_bins
    bound = 1.0 / jnp.sqrt(fan_in)
    w = jax.random.uniform(k_w, (2 * num_bins, num_bins),
                           minval=-bound, maxval=bound, dtype=jnp.float32)
    b = jax.random.uniform(k_b, (num_bins,),
                           minval=-bound, maxval=bound, dtype=jnp.float32)

    # --- case 1: tiny (S*C = 8 rows) -> small-M XLA fast path ----------------
    samples, channels = 2, 4
    preds_semantics_base = jax.random.normal(
        k_sem, (samples, num_classes), dtype=jnp.float32)
    preds_color_base = jax.random.normal(
        k_base, (samples, channels, num_bins), dtype=jnp.float32)
    preds_color_expert = jax.random.normal(
        k_exp, (samples, channels, num_bins), dtype=jnp.float32)

    sem_out, color_out = color_model_linear_forward(
        preds_semantics_base, preds_color_base, preds_color_expert, w, b)
    jax.block_until_ready((sem_out, color_out))
    y_ref = _reference(preds_color_base, preds_color_expert, w, b)
    assert sem_out.shape == (samples, num_classes)
    assert color_out.shape == (samples, channels, num_bins)
    assert jnp.allclose(color_out, y_ref, atol=1e-5, rtol=1e-5)
    assert jnp.array_equal(sem_out, preds_semantics_base)

    # --- case 2: moderate ragged row count (S*C = 185) -> Pallas, partial ----
    #     block masked (tm_eff = 192, grid = 1), no pad / slice copies.
    s2, c2 = 37, 5
    xb2 = jax.random.normal(k_b2, (s2, c2, num_bins), dtype=jnp.float32)
    xe2 = jax.random.normal(k_e2, (s2, c2, num_bins), dtype=jnp.float32)
    _, y2 = color_model_linear_forward(preds_semantics_base, xb2, xe2, w, b)
    jax.block_until_ready(y2)
    assert y2.shape == (s2, c2, num_bins)
    assert jnp.allclose(y2, _reference(xb2, xe2, w, b), atol=1e-5, rtol=1e-5)

    # --- case 3: larger ragged row count (S*C = 1050) -> 2 balanced grid -----
    #     steps of 528 rows, trailing block masked.
    s3, c3 = 210, 5
    xb3 = jax.random.normal(k_b3, (s3, c3, num_bins), dtype=jnp.float32)
    xe3 = jax.random.normal(k_e3, (s3, c3, num_bins), dtype=jnp.float32)
    _, y3 = color_model_linear_forward(preds_semantics_base, xb3, xe3, w, b)
    jax.block_until_ready(y3)
    assert y3.shape == (s3, c3, num_bins)
    y3_ref = _reference(xb3, xe3, w, b)
    assert jnp.allclose(y3, y3_ref, atol=1e-5, rtol=1e-5)

    # --- case 4: optional bf16-activation path on the same data --------------
    _, y4 = color_model_linear_forward(preds_semantics_base, xb3, xe3, w, b,
                                       compute_dtype=jnp.bfloat16)
    jax.block_until_ready(y4)
    assert y4.shape == (s3, c3, num_bins)
    assert jnp.allclose(y4, y3_ref, atol=1e-1)

    print("KERNEL_OK")
</pallas_src>

<mosaic_0001>
module attributes {stable_mosaic.version = 11 : i64} {
  func.func @_fusion_fc_kernel(%arg0: i32, %arg1: memref<192x128xf32, #tpu.memory_space<vmem>>, %arg2: memref<192x128xf32, #tpu.memory_space<vmem>>, %arg3: memref<128x128xf32, #tpu.memory_space<vmem>>, %arg4: memref<128x128xf32, #tpu.memory_space<vmem>>, %arg5: memref<8x128xf32, #tpu.memory_space<vmem>>, %arg6: memref<192x128xf32, #tpu.memory_space<vmem>>) attributes {dimension_semantics = [#tpu.dimension_semantics<parallel>], iteration_bounds = array<i64: 1>, scalar_prefetch = 0 : i64, scratch_operands = 0 : i64, tpu.core_type = #tpu.core_type<tc>, window_params = [{transform_indices = @transform_0, window_bounds = array<i64: 192, 128>}, {transform_indices = @transform_1, window_bounds = array<i64: 192, 128>}, {pipeline_mode = #tpu.pipeline_mode<synchronous>, transform_indices = @transform_2, window_bounds = array<i64: 128, 128>}, {pipeline_mode = #tpu.pipeline_mode<synchronous>, transform_indices = @transform_3, window_bounds = array<i64: 128, 128>}, {pipeline_mode = #tpu.pipeline_mode<synchronous>, transform_indices = @transform_4, window_bounds = array<i64: 8, 128>}, {transform_indices = @transform_5, window_bounds = array<i64: 192, 128>}]} {
    %c0 = arith.constant 0 : index
    %c0_0 = arith.constant 0 : index
    %0 = vector.load %arg1[%c0, %c0_0] : memref<192x128xf32, #tpu.memory_space<vmem>>, vector<192x128xf32>
    %c0_1 = arith.constant 0 : index
    %c0_2 = arith.constant 0 : index
    %1 = vector.load %arg3[%c0_1, %c0_2] : memref<128x128xf32, #tpu.memory_space<vmem>>, vector<128x128xf32>
    %cst = arith.constant dense<0.000000e+00> : vector<192x128xf32>
    %2 = tpu.matmul %0, %1, %cst {dimension_numbers = #tpu.dot_dimension_numbers<[1], [0], [0], [1], [0, 0, 1, 1], [], []>} : vector<192x128xf32>, vector<128x128xf32>, vector<192x128xf32> -> vector<192x128xf32>
    %c0_3 = arith.constant 0 : index
    %c0_4 = arith.constant 0 : index
    %3 = vector.load %arg2[%c0_3, %c0_4] : memref<192x128xf32, #tpu.memory_space<vmem>>, vector<192x128xf32>
    %c0_5 = arith.constant 0 : index
    %c0_6 = arith.constant 0 : index
    %4 = vector.load %arg4[%c0_5, %c0_6] : memref<128x128xf32, #tpu.memory_space<vmem>>, vector<128x128xf32>
    %cst_7 = arith.constant dense<0.000000e+00> : vector<192x128xf32>
    %5 = tpu.matmul %3, %4, %cst_7 {dimension_numbers = #tpu.dot_dimension_numbers<[1], [0], [0], [1], [0, 0, 1, 1], [], []>} : vector<192x128xf32>, vector<128x128xf32>, vector<192x128xf32> -> vector<192x128xf32>
    %6 = arith.addf %2, %5 : vector<192x128xf32>
    %c0_8 = arith.constant 0 : index
    %c0_9 = arith.constant 0 : index
    %7 = vector.load %arg5[%c0_8, %c0_9] : memref<8x128xf32, #tpu.memory_space<vmem>>, vector<1x128xf32>
    %8 = vector.broadcast %7 : vector<1x128xf32> to vector<192x128xf32>
    %9 = arith.addf %6, %8 : vector<192x128xf32>
    %c0_10 = arith.constant 0 : index
    %c0_11 = arith.constant 0 : index
    %10 = vector.load %arg6[%c0_10, %c0_11] : memref<192x128xf32, #tpu.memory_space<vmem>>, vector<192x128xf32>
    tpu.vector_store %arg6[%c0_10, %c0_11], %9 {strides = array<i32>} : memref<192x128xf32, #tpu.memory_space<vmem>>, vector<192x128xf32>,
    return
  }
  func.func @transform_0(%arg0: i32) -> (i32, i32) {
    %c0_i32 = arith.constant 0 : i32
    %c0_i32_0 = arith.constant 0 : i32
    return %arg0, %c0_i32 : i32, i32
  }
  func.func @transform_1(%arg0: i32) -> (i32, i32) {
    %c0_i32 = arith.constant 0 : i32
    %c0_i32_0 = arith.constant 0 : i32
    return %arg0, %c0_i32 : i32, i32
  }
  func.func @transform_2(%arg0: i32) -> (i32, i32) {
    %c0_i32 = arith.constant 0 : i32
    %c0_i32_0 = arith.constant 0 : i32
    %c0_i32_1 = arith.constant 0 : i32
    return %c0_i32, %c0_i32_0 : i32, i32
  }
  func.func @transform_3(%arg0: i32) -> (i32, i32) {
    %c0_i32 = arith.constant 0 : i32
    %c0_i32_0 = arith.constant 0 : i32
    %c0_i32_1 = arith.constant 0 : i32
    return %c0_i32, %c0_i32_0 : i32, i32
  }
  func.func @transform_4(%arg0: i32) -> (i32, i32) {
    %c0_i32 = arith.constant 0 : i32
    %c0_i32_0 = arith.constant 0 : i32
    %c0_i32_1 = arith.constant 0 : i32
    return %c0_i32, %c0_i32_0 : i32, i32
  }
  func.func @transform_5(%arg0: i32) -> (i32, i32) {
    %c0_i32 = arith.constant 0 : i32
    %c0_i32_0 = arith.constant 0 : i32
    return %arg0, %c0_i32 : i32, i32
  }
}

</mosaic_0001>

<bundles_post_ra>
// kernel: tpu_custom_call.1
= control target key start
LH: loop header
LB: loop body
LE: loop exit
PB: predicated region body
PF: predicated region fallthrough
CT: control target
= control target key end

     0   :  { %10 = vsyncpa [#allocation3], 0  ;;  %s1183_s0 = inlined_call_operand.hbm [shape: f32[185,128], index: 0, kind: input, shape index: {}]   ;;  %s1184_s1 = inlined_call_operand.hbm [shape: f32[185,128], index: 1, kind: input, shape index: {}]   ;;  %s1185_s2 = inlined_call_operand.hbm [shape: f32[128,128], index: 2, kind: input, shape index: {}]   ;;  %s1186_s3 = inlined_call_operand.hbm [shape: f32[128,128], index: 3, kind: input, shape index: {}]   ;;  %s1187_s4 = inlined_call_operand.vmem [shape: f32[8,128], index: 4, kind: input, shape index: {}]   ;;  %s1188_s5 = inlined_call_operand.hbm [shape: f32[185,128], index: 5, kind: output, shape index: {}]  }
   0x1   :  { %11 = vsyncpa [#allocation6], 0 }
   0x2   :  { %12 = vsyncpa [#allocation9], 0 }
   0x3   :  { %13 = vsyncpa [#allocation4], 0  ;;  %s1028_s18 = smov [#allocation5]   ;;  %s1029_s20 = smov [#allocation2]  }
   0x4   :  { %s31_s19 = sshll.u32 %s1028_s18, 4  ;;  %s19_s21 = sshll.u32 %s1029_s20, 4  ;;  %s32_s19 = int_to_ptr.vmem [resolvable:$true] %s31_s19  ;;  %s1065_s21 = int_to_ptr.vmem [resolvable:$true] %s19_s21 }
   0x5   :  { %s910_s24 = scalar_lea.hbm %s1184_s1, 3072 }
   0x6   :  { %p911_p0 = scmp.ne.s32.totalorder %s1184_s1, %s910_s24  ;;  %p914_p1 = scmp.lt.u32.totalorder %s910_s24, %s1184_s1 }
   0x8   :  { %p916_p2 = pnand %p914_p1, %p911_p0 }
   0xa   :  { %919 = shalt.err (!%p916_p2)
}
   0xb   :  { %s920_s29 = scalar_lea.vmem %s32_s19, 3072  ;;  %p925_p4 = scmp.lt.s32.totalorder %s32_s19, %s32_s19 }
   0xc   :  { %p921_p3 = scmp.ne.s32.totalorder %s32_s19, %s920_s29  ;;  %p926_p5 = scmp.lt.s32.totalorder %s920_s29, %s920_s29 }
   0xe   :  { %p927_p6 = por %p926_p5, %p925_p4 }
  0x10   :  { %p928_p7 = pnand %p927_p6, %p921_p3 }
  0x12   :  { %931 = shalt.err (!%p928_p7)
}
  0x13   :  { %s1030_s30 = smov 128   ;;  %s1031_s6 = smov 8  }
  0x14   :  { %37 = dma.hbm_to_vmem [thread:$0]  %s1184_s1, 3072, %s32_s19, [#allocation6], %s1030_s30, %s1030_s30, %s1031_s6  }
  0x15   :  { %s932_s11 = scalar_lea.hbm %s1183_s0, 3072 }
  0x16   :  { %p933_p8 = scmp.ne.s32.totalorder %s1183_s0, %s932_s11  ;;  %p936_p9 = scmp.lt.u32.totalorder %s932_s11, %s1183_s0 }
  0x18   :  { %p938_p10 = pnand %p936_p9, %p933_p8 }
  0x1a   :  { %941 = shalt.err (!%p938_p10)
}
  0x1b   :  { %s942_s16 = scalar_lea.vmem %s1065_s21, 3072  ;;  %p947_p12 = scmp.lt.s32.totalorder %s1065_s21, %s1065_s21 }
  0x1c   :  { %p943_p11 = scmp.ne.s32.totalorder %s1065_s21, %s942_s16  ;;  %p948_p13 = scmp.lt.s32.totalorder %s942_s16, %s942_s16 }
  0x1e   :  { %p949_p0 = por %p948_p13, %p947_p12 }
  0x20   :  { %p950_p1 = pnand %p949_p0, %p943_p11 }
  0x22   :  { %953 = shalt.err (!%p950_p1)
}
  0x23   :  { %25 = dma.hbm_to_vmem [thread:$0]  %s1183_s0, 3072, %s1065_s21, [#allocation3], %s1030_s30, %s1030_s30, %s1031_s6  }
  0x24   :  { %s1032_s18 = smov [#allocation7]   ;;  %s1033_s20 = smov [#allocation8]  }
  0x25   :  { %s43_s19 = sshll.u32 %s1032_s18, 4  ;;  %s55_s22 = sshll.u32 %s1033_s20, 4  ;;  %s44_s19 = int_to_ptr.vmem [resolvable:$true] %s43_s19  ;;  %s1102_s22 = int_to_ptr.vmem [resolvable:$true] %s55_s22 }
  0x26   :  { %s954_s25 = scalar_lea.hbm %s1185_s2, 2048 }
  0x27   :  { %p955_p2 = scmp.ne.s32.totalorder %s1185_s2, %s954_s25  ;;  %p958_p3 = scmp.lt.u32.totalorder %s954_s25, %s1185_s2 }
  0x29   :  { %p960_p4 = pnand %p958_p3, %p955_p2 }
  0x2b   :  { %963 = shalt.err (!%p960_p4)
}
  0x2c   :  { %s964_s0 = scalar_lea.vmem %s44_s19, 2048  ;;  %p969_p6 = scmp.lt.s32.totalorder %s44_s19, %s44_s19 }
  0x2d   :  { %p965_p5 = scmp.ne.s32.totalorder %s44_s19, %s964_s0  ;;  %p970_p7 = scmp.lt.s32.totalorder %s964_s0, %s964_s0 }
  0x2f   :  { %p971_p8 = por %p970_p7, %p969_p6 }
  0x31   :  { %p972_p9 = pnand %p971_p8, %p965_p5 }
  0x33   :  { %975 = shalt.err (!%p972_p9)
}
  0x34   :  { %49 = dma.hbm_to_vmem [thread:$0]  %s1185_s2, 2048, %s44_s19, [#allocation6], %s1030_s30, %s1030_s30, %s1031_s6  }
  0x35   :  { %s976_s10 = scalar_lea.hbm %s1186_s3, 2048 }
  0x36   :  { %p977_p10 = scmp.ne.s32.totalorder %s1186_s3, %s976_s10  ;;  %p980_p11 = scmp.lt.u32.totalorder %s976_s10, %s1186_s3 }
  0x38   :  { %p982_p12 = pnand %p980_p11, %p977_p10 }
  0x3a   :  { %985 = shalt.err (!%p982_p12)
}
  0x3b   :  { %s986_s15 = scalar_lea.vmem %s1102_s22, 2048  ;;  %p991_p0 = scmp.lt.s32.totalorder %s1102_s22, %s1102_s22 }
  0x3c   :  { %p987_p13 = scmp.ne.s32.totalorder %s1102_s22, %s986_s15  ;;  %p992_p1 = scmp.lt.s32.totalorder %s986_s15, %s986_s15 }
  0x3e   :  { %p993_p2 = por %p992_p1, %p991_p0 }
  0x40   :  { %p994_p3 = pnand %p993_p2, %p987_p13 }
  0x42   :  { %997 = shalt.err (!%p994_p3)
}
  0x43   :  { %61 = dma.hbm_to_vmem [thread:$0]  %s1186_s3, 2048, %s1102_s22, [#allocation9], %s1030_s30, %s1030_s30, %s1031_s6  }
  0x44   :  { %1020 = dma.done.wait [#allocation3], 3072  }
  0x45   :  { %1021 = vsyncadd [#allocation3], 4294964224 }
  0x46   :  { %1022 = dma.done.wait [#allocation6], 5120  }
  0x47   :  { %1023 = vsyncadd [#allocation6], 4294962176 }
  0x48   :  { %1024 = dma.done.wait [#allocation9], 2048  }
  0x49   :  { %1025 = vsyncadd [#allocation9], 4294965248  ;;  %v140_v0 = vld [vmem:[#allocation8] sm:$0xff]  ;;  %v141_v1 = vld [vmem:[#allocation8 + $0x8] sm:$0xff] }
  0x4a   :  { %v100_v2 = vld [vmem:[#allocation7] sm:$0xff]  ;;  %v815_v3 = vpack.c.bf16 %v141_v1, %v140_v0  ;;  %v101_v4 = vld [vmem:[#allocation7 + $0x8] sm:$0xff]  ;;  %v142_v5 = vld [vmem:[#allocation8 + $0x10] sm:$0xff] }
  0x4b   :  { %v143_v6 = vld [vmem:[#allocation8 + $0x18] sm:$0xff]  ;;  %v847_v7 = vpack.c.bf16 %v101_v4, %v100_v2  ;;  %v102_v9 = vld [vmem:[#allocation7 + $0x10] sm:$0xff]  ;;  %v144_v11 = vld [vmem:[#allocation8 + $0x20] sm:$0xff] }
  0x4c   :  { %v819_v8 = vpack.c.bf16 %v143_v6, %v142_v5  ;;  %v103_v10 = vld [vmem:[#allocation7 + $0x18] sm:$0xff]  ;;  %816 = vmatprep.subr.bf16.mxu1 %v815_v3  ;;  %v145_v13 = vld [vmem:[#allocation8 + $0x28] sm:$0xff]  ;;  %v104_v14 = vld [vmem:[#allocation7 + $0x20] sm:$0xff] }
  0x4d   :  { %v851_v12 = vpack.c.bf16 %v103_v10, %v102_v9  ;;  %v105_v15 = vld [vmem:[#allocation7 + $0x28] sm:$0xff]  ;;  %848 = vmatprep.subr.bf16.mxu0 %v847_v7  ;;  %818 = vmatpush3.bf16.msra.mxu1 %v815_v3  ;;  %v823_v16 = vpack.c.bf16 %v145_v13, %v144_v11  ;;  %v146_v18 = vld [vmem:[#allocation8 + $0x30] sm:$0xff]  ;;  %v147_v19 = vld [vmem:[#allocation8 + $0x38] sm:$0xff] }
  0x4e   :  { %850 = vmatpush3.bf16.msra.mxu0 %v847_v7  ;;  %820 = vmatprep.subr.bf16.mxu1 %v819_v8  ;;  %v855_v17 = vpack.c.bf16 %v105_v15, %v104_v14  ;;  %v106_v20 = vld [vmem:[#allocation7 + $0x30] sm:$0xff]  ;;  %v107_v21 = vld [vmem:[#allocation7 + $0x38] sm:$0xff]  ;;  %v827_v22 = vpack.c.bf16 %v147_v19, %v146_v18  ;;  %v148_v24 = vld [vmem:[#allocation8 + $0x40] sm:$0xff] }
  0x4f   :  { %852 = vmatprep.subr.bf16.mxu0 %v851_v12  ;;  %v859_v23 = vpack.c.bf16 %v107_v21, %v106_v20  ;;  %v149_v25 = vld [vmem:[#allocation8 + $0x48] sm:$0xff]  ;;  %v116_v26 = vld [vmem:[#allocation5] sm:$0xff]  ;;  %v150_v32 = vld [vmem:[#allocation8 + $0x50] sm:$0xff] }
  0x50   :  { %v108_v27 = vld [vmem:[#allocation7 + $0x40] sm:$0xff]  ;;  %v109_v28 = vld [vmem:[#allocation7 + $0x48] sm:$0xff]  ;;  %711 = vmatprep.mubr.f32.mxu1 %v116_v26  ;;  %v831_v30 = vpack.c.bf16 %v149_v25, %v148_v24  ;;  %v151_v33 = vld [vmem:[#allocation8 + $0x58] sm:$0xff] }
  0x51   :  { %822 = vmatpush3.bf16.msra.mxu1 %v819_v8  ;;  %v76_v29 = vld [vmem:[#allocation2] sm:$0xff]  ;;  %v863_v31 = vpack.c.bf16 %v109_v28, %v108_v27  ;;  %v110_v34 = vld [vmem:[#allocation7 + $0x50] sm:$0xff]  ;;  %v111_v35 = vld [vmem:[#allocation7 + $0x58] sm:$0xff]  ;;  %v835_v36 = vpack.c.bf16 %v151_v33, %v150_v32 }
  0x52   :  { %854 = vmatpush3.bf16.msra.mxu0 %v851_v12  ;;  %824 = vmatprep.subr.bf16.mxu1 %v823_v16  ;;  %v867_v37 = vpack.c.bf16 %v111_v35, %v110_v34  ;;  %v152_v38 = vld [vmem:[#allocation8 + $0x60] sm:$0xff]  ;;  %v153_v39 = vld [vmem:[#allocation8 + $0x68] sm:$0xff]  ;;  %v154_v44 = vld [vmem:[#allocation8 + $0x70] sm:$0xff] }
  0x53   :  { %856 = vmatprep.subr.bf16.mxu0 %v855_v17  ;;  %779 = vmatprep.mubr.f32.mxu0 %v76_v29  ;;  %v112_v40 = vld [vmem:[#allocation7 + $0x60] sm:$0xff]  ;;  %v113_v41 = vld [vmem:[#allocation7 + $0x68] sm:$0xff]  ;;  %v839_v42 = vpack.c.bf16 %v153_v39, %v152_v38  ;;  %v155_v45 = vld [vmem:[#allocation8 + $0x78] sm:$0xff] }
  0x54   :  { %v871_v43 = vpack.c.bf16 %v113_v41, %v112_v40  ;;  %v114_v46 = vld [vmem:[#allocation7 + $0x70] sm:$0xff]  ;;  %v115_v47 = vld [vmem:[#allocation7 + $0x78] sm:$0xff]  ;;  %v843_v48 = vpack.c.bf16 %v155_v45, %v154_v44  ;;  %v117_v50 = vld [vmem:[#allocation5 + $0x8] sm:$0xff] }
  0x55   :  { %826 = vmatpush3.bf16.msra.mxu1 %v823_v16  ;;  %v875_v49 = vpack.c.bf16 %v115_v47, %v114_v46  ;;  %v77_v51 = vld [vmem:[#allocation2 + $0x8] sm:$0xff]  ;;  %v118_v52 = vld [vmem:[#allocation5 + $0x10] sm:$0xff]  ;;  %v119_v54 = vld [vmem:[#allocation5 + $0x18] sm:$0xff] }
  0x56   :  { %858 = vmatpush3.bf16.msra.mxu0 %v855_v17  ;;  %828 = vmatprep.subr.bf16.mxu1 %v827_v22  ;;  %v78_v53 = vld [vmem:[#allocation2 + $0x10] sm:$0xff]  ;;  %v79_v55 = vld [vmem:[#allocation2 + $0x18] sm:$0xff]  ;;  %v120_v56 = vld [vmem:[#allocation5 + $0x20] sm:$0xff] }
  0x57   :  { %860 = vmatprep.subr.bf16.mxu0 %v859_v23  ;;  %v80_v57 = vld [vmem:[#allocation2 + $0x20] sm:$0xff]  ;;  %v121_v58 = vld [vmem:[#allocation5 + $0x28] sm:$0xff]  ;;  %v122_v60 = vld [vmem:[#allocation5 + $0x30] sm:$0xff] }
  0x58   :  { %v81_v59 = vld [vmem:[#allocation2 + $0x28] sm:$0xff]  ;;  %v82_v61 = vld [vmem:[#allocation2 + $0x30] sm:$0xff]  ;;  %v123_v62 = vld [vmem:[#allocation5 + $0x38] sm:$0xff] }
  0x59   :  { %830 = vmatpush3.bf16.msra.mxu1 %v827_v22  ;;  %v83_v63 = vld [vmem:[#allocation2 + $0x38] sm:$0xff]  ;;  %v124_v0 = vld [vmem:[#allocation5 + $0x40] sm:$0xff]  ;;  %v125_v2 = vld [vmem:[#allocation5 + $0x48] sm:$0xff] }
  0x5a   :  { %862 = vmatpush3.bf16.msra.mxu0 %v859_v23  ;;  %832 = vmatprep.subr.bf16.mxu1 %v831_v30  ;;  %v84_v1 = vld [vmem:[#allocation2 + $0x40] sm:$0xff]  ;;  %v85_v3 = vld [vmem:[#allocation2 + $0x48] sm:$0xff]  ;;  %v126_v4 = vld [vmem:[#allocation5 + $0x50] sm:$0xff] }
  0x5b   :  { %864 = vmatprep.subr.bf16.mxu0 %v863_v31  ;;  %v86_v5 = vld [vmem:[#allocation2 + $0x50] sm:$0xff]  ;;  %v127_v6 = vld [vmem:[#allocation5 + $0x58] sm:$0xff]  ;;  %v128_v8 = vld [vmem:[#allocation5 + $0x60] sm:$0xff] }
  0x5c   :  { %v87_v7 = vld [vmem:[#allocation2 + $0x58] sm:$0xff]  ;;  %v88_v9 = vld [vmem:[#allocation2 + $0x60] sm:$0xff]  ;;  %v129_v10 = vld [vmem:[#allocation5 + $0x68] sm:$0xff] }
  0x5d   :  { %834 = vmatpush3.bf16.msra.mxu1 %v831_v30  ;;  %v89_v11 = vld [vmem:[#allocation2 + $0x68] sm:$0xff]  ;;  %v130_v12 = vld [vmem:[#allocation5 + $0x70] sm:$0xff]  ;;  %v131_v14 = vld [vmem:[#allocation5 + $0x78] sm:$0xff] }
  0x5e   :  { %866 = vmatpush3.bf16.msra.mxu0 %v863_v31  ;;  %836 = vmatprep.subr.bf16.mxu1 %v835_v36  ;;  %v90_v13 = vld [vmem:[#allocation2 + $0x70] sm:$0xff]  ;;  %v91_v15 = vld [vmem:[#allocation2 + $0x78] sm:$0xff]  ;;  %v132_v16 = vld [vmem:[#allocation5 + $0x80] sm:$0xff] }
  0x5f   :  { %868 = vmatprep.subr.bf16.mxu0 %v867_v37  ;;  %v92_v17 = vld [vmem:[#allocation2 + $0x80] sm:$0xff]  ;;  %v133_v18 = vld [vmem:[#allocation5 + $0x88] sm:$0xff]  ;;  %v134_v20 = vld [vmem:[#allocation5 + $0x90] sm:$0xff] }
  0x60   :  { %v93_v19 = vld [vmem:[#allocation2 + $0x88] sm:$0xff]  ;;  %v94_v21 = vld [vmem:[#allocation2 + $0x90] sm:$0xff]  ;;  %v135_v22 = vld [vmem:[#allocation5 + $0x98] sm:$0xff] }
  0x61   :  { %838 = vmatpush3.bf16.msra.mxu1 %v835_v36  ;;  %v95_v23 = vld [vmem:[#allocation2 + $0x98] sm:$0xff]  ;;  %v136_v24 = vld [vmem:[#allocation5 + $0xa0] sm:$0xff]  ;;  %v137_v26 = vld [vmem:[#allocation5 + $0xa8] sm:$0xff] }
  0x62   :  { %870 = vmatpush3.bf16.msra.mxu0 %v867_v37  ;;  %840 = vmatprep.subr.bf16.mxu1 %v839_v42  ;;  %v96_v25 = vld [vmem:[#allocation2 + $0xa0] sm:$0xff]  ;;  %v97_v27 = vld [vmem:[#allocation2 + $0xa8] sm:$0xff]  ;;  %v138_v28 = vld [vmem:[#allocation5 + $0xb0] sm:$0xff] }
  0x63   :  { %872 = vmatprep.subr.bf16.mxu0 %v871_v43  ;;  %v98_v29 = vld [vmem:[#allocation2 + $0xb0] sm:$0xff]  ;;  %v139_v30 = vld [vmem:[#allocation5 + $0xb8] sm:$0xff]  ;;  %v1142_v34 = vld [vmem:[%s1187_s4] ss:$0 sm:$0xff]  ;;  %s1034_s4 = smov [#allocation10]  }
  0x64   :  { %v99_v31 = vld [vmem:[#allocation2 + $0xb8] sm:$0xff]  ;;  %s584_s17 = sshll.u32 %s1034_s4, 4  ;;  %s585_s17 = int_to_ptr.vmem [resolvable:$true] %s584_s17 }
  0x65   :  { %842 = vmatpush3.bf16.msra.mxu1 %v839_v42  ;;  %s998_s18 = scalar_lea.vmem %s585_s17, 3072  ;;  %p1003_p5 = scmp.lt.s32.totalorder %s585_s17, %s585_s17 }
  0x66   :  { %874 = vmatpush3.bf16.msra.mxu0 %v871_v43  ;;  %844 = vmatprep.subr.bf16.mxu1 %v843_v48  ;;  %p999_p4 = scmp.ne.s32.totalorder %s585_s17, %s998_s18  ;;  %p1004_p6 = scmp.lt.s32.totalorder %s998_s18, %s998_s18 }
  0x67   :  { %876 = vmatprep.subr.bf16.mxu0 %v875_v49 }
  0x68   :  { %p1005_p7 = por %p1004_p6, %p1003_p5 }
  0x69   :  { %846 = vmatpush3.bf16.msra.mxu1 %v843_v48 }
  0x6a   :  { %878 = vmatpush3.bf16.msra.mxu0 %v875_v49  ;;  %p1006_p8 = pnand %p1005_p7, %p999_p4 }
  0x6c   :  { %712 = vmatmul.mubr.f32.vlgmr.msra.gmra.mrb[0].mxu1 %v117_v50 }
  0x6d   :  { %780 = vmatmul.mubr.f32.vlgmr.msra.gmra.mrb[0].mxu0 %v77_v51  ;;  %714 = vmatprep.mubr.f32.mxu1 %v118_v52 }
  0x6e   :  { %782 = vmatprep.mubr.f32.mxu0 %v78_v53 }
  0x70   :  { %715 = vmatmul.mubr.f32.gmra.mrb[2].mxu1 %v119_v54 }
  0x71   :  { %783 = vmatmul.mubr.f32.gmra.mrb[2].mxu0 %v79_v55  ;;  %717 = vmatprep.mubr.f32.mxu1 %v120_v56 }
  0x72   :  { %785 = vmatprep.mubr.f32.mxu0 %v80_v57 }
  0x74   :  { %718 = vmatmul.mubr.f32.gmra.mrb[4].mxu1 %v121_v58 }
  0x75   :  { %786 = vmatmul.mubr.f32.gmra.mrb[4].mxu0 %v81_v59  ;;  %720 = vmatprep.mubr.f32.mxu1 %v122_v60 }
  0x76   :  { %788 = vmatprep.mubr.f32.mxu0 %v82_v61 }
  0x78   :  { %721 = vmatmul.mubr.f32.gmra.mrb[6].mxu1 %v123_v62 }
  0x79   :  { %789 = vmatmul.mubr.f32.gmra.mrb[6].mxu0 %v83_v63  ;;  %723 = vmatprep.mubr.f32.mxu1 %v124_v0 }
  0x7a   :  { %791 = vmatprep.mubr.f32.mxu0 %v84_v1 }
  0x7c   :  { %724 = vmatmul.mubr.f32.gmra.mrb[8].mxu1 %v125_v2 }
  0x7d   :  { %792 = vmatmul.mubr.f32.gmra.mrb[8].mxu0 %v85_v3  ;;  %726 = vmatprep.mubr.f32.mxu1 %v126_v4 }
  0x7e   :  { %794 = vmatprep.mubr.f32.mxu0 %v86_v5 }
  0x80   :  { %727 = vmatmul.mubr.f32.gmra.mrb[10].mxu1 %v127_v6 }
  0x81   :  { %795 = vmatmul.mubr.f32.gmra.mrb[10].mxu0 %v87_v7  ;;  %729 = vmatprep.mubr.f32.mxu1 %v128_v8 }
  0x82   :  { %797 = vmatprep.mubr.f32.mxu0 %v88_v9 }
  0x84   :  { %730 = vmatmul.mubr.f32.gmra.mrb[12].mxu1 %v129_v10 }
  0x85   :  { %798 = vmatmul.mubr.f32.gmra.mrb[12].mxu0 %v89_v11  ;;  %732 = vmatprep.mubr.f32.mxu1 %v130_v12 }
  0x86   :  { %800 = vmatprep.mubr.f32.mxu0 %v90_v13 }
  0x88   :  { %733 = vmatmul.mubr.f32.gmra.mrb[14].mxu1 %v131_v14 }
  0x89   :  { %801 = vmatmul.mubr.f32.gmra.mrb[14].mxu0 %v91_v15  ;;  %735 = vmatprep.mubr.f32.mxu1 %v132_v16 }
  0x8a   :  { %803 = vmatprep.mubr.f32.mxu0 %v92_v17 }
  0x8c   :  { %736 = vmatmul.mubr.f32.gmra.mrb[16].mxu1 %v133_v18 }
  0x8d   :  { %804 = vmatmul.mubr.f32.gmra.mrb[16].mxu0 %v93_v19  ;;  %738 = vmatprep.mubr.f32.mxu1 %v134_v20 }
  0x8e   :  { %806 = vmatprep.mubr.f32.mxu0 %v94_v21 }
  0x90   :  { %739 = vmatmul.mubr.f32.gmra.mrb[18].mxu1 %v135_v22 }
  0x91   :  { %807 = vmatmul.mubr.f32.gmra.mrb[18].mxu0 %v95_v23  ;;  %741 = vmatprep.mubr.f32.mxu1 %v136_v24 }
  0x92   :  { %809 = vmatprep.mubr.f32.mxu0 %v96_v25 }
  0x94   :  { %742 = vmatmul.mubr.f32.gmra.mrb[20].mxu1 %v137_v26 }
  0x95   :  { %810 = vmatmul.mubr.f32.gmra.mrb[20].mxu0 %v97_v27  ;;  %744 = vmatprep.mubr.f32.mxu1 %v138_v28 }
  0x96   :  { %812 = vmatprep.mubr.f32.mxu0 %v98_v29 }
  0x98   :  { %745 = vmatmul.mubr.f32.gmra.mrb[22].mxu1 %v139_v30 }
  0x99   :  { %813 = vmatmul.mubr.f32.gmra.mrb[22].mxu0 %v99_v31 }
 0x13f   :  { %v713_v32 = vpop.f32.mrb[0].mxu1 }
 0x140   :  { %v781_v33 = vpop.f32.mrb[0].mxu0  ;;  %v222_v35 = vpop.f32.mrb[1].mxu1 }
 0x141   :  { %v413_v36 = vadd.f32 %v781_v33, %v713_v32  ;;  %v407_v37 = vpop.f32.mrb[1].mxu0 }
 0x142   :  { %v408_v38 = vadd.f32 %v407_v37, %v222_v35 }
 0x143   :  { %v532_v39 = vadd.f32 %v1142_v34, %v413_v36  ;;  %v716_v40 = vpop.f32.mrb[2].mxu1 }
 0x144   :  { %v531_v41 = vadd.f32 %v1142_v34, %v408_v38  ;;  %v784_v42 = vpop.f32.mrb[2].mxu0  ;;  %v232_v43 = vpop.f32.mrb[3].mxu1 }
 0x145   :  { %556 = vst [vmem:[#allocation10 + $0x8] sm:$0xff] %v532_v39  ;;  %v423_v44 = vadd.f32 %v784_v42, %v716_v40  ;;  %v417_v45 = vpop.f32.mrb[3].mxu0 }
 0x146   :  { %555 = vst [vmem:[#allocation10] sm:$0xff] %v531_v41  ;;  %v418_v46 = vadd.f32 %v417_v45, %v232_v43 }
 0x147   :  { %v534_v47 = vadd.f32 %v1142_v34, %v423_v44  ;;  %v719_v48 = vpop.f32.mrb[4].mxu1 }
 0x148   :  { %v533_v49 = vadd.f32 %v1142_v34, %v418_v46  ;;  %v787_v50 = vpop.f32.mrb[4].mxu0  ;;  %v242_v51 = vpop.f32.mrb[5].mxu1 }
 0x149   :  { %558 = vst [vmem:[#allocation10 + $0x18] sm:$0xff] %v534_v47  ;;  %v433_v52 = vadd.f32 %v787_v50, %v719_v48  ;;  %v427_v53 = vpop.f32.mrb[5].mxu0 }
 0x14a   :  { %557 = vst [vmem:[#allocation10 + $0x10] sm:$0xff] %v533_v49  ;;  %v428_v54 = vadd.f32 %v427_v53, %v242_v51 }
 0x14b   :  { %v536_v55 = vadd.f32 %v1142_v34, %v433_v52  ;;  %v722_v56 = vpop.f32.mrb[6].mxu1 }
 0x14c   :  { %v535_v57 = vadd.f32 %v1142_v34, %v428_v54  ;;  %v790_v58 = vpop.f32.mrb[6].mxu0  ;;  %v252_v59 = vpop.f32.mrb[7].mxu1 }
 0x14d   :  { %560 = vst [vmem:[#allocation10 + $0x28] sm:$0xff] %v536_v55  ;;  %v443_v60 = vadd.f32 %v790_v58, %v722_v56  ;;  %v437_v61 = vpop.f32.mrb[7].mxu0 }
 0x14e   :  { %559 = vst [vmem:[#allocation10 + $0x20] sm:$0xff] %v535_v57  ;;  %v438_v62 = vadd.f32 %v437_v61, %v252_v59 }
 0x14f   :  { %v538_v63 = vadd.f32 %v1142_v34, %v443_v60  ;;  %v725_v0 = vpop.f32.mrb[8].mxu1 }
 0x150   :  { %v537_v1 = vadd.f32 %v1142_v34, %v438_v62  ;;  %v793_v2 = vpop.f32.mrb[8].mxu0  ;;  %v262_v3 = vpop.f32.mrb[9].mxu1 }
 0x151   :  { %562 = vst [vmem:[#allocation10 + $0x38] sm:$0xff] %v538_v63  ;;  %v453_v4 = vadd.f32 %v793_v2, %v725_v0  ;;  %v447_v5 = vpop.f32.mrb[9].mxu0 }
 0x152   :  { %561 = vst [vmem:[#allocation10 + $0x30] sm:$0xff] %v537_v1  ;;  %v448_v6 = vadd.f32 %v447_v5, %v262_v3 }
 0x153   :  { %v540_v7 = vadd.f32 %v1142_v34, %v453_v4  ;;  %v728_v8 = vpop.f32.mrb[10].mxu1 }
 0x154   :  { %v539_v9 = vadd.f32 %v1142_v34, %v448_v6  ;;  %v796_v10 = vpop.f32.mrb[10].mxu0  ;;  %v272_v11 = vpop.f32.mrb[11].mxu1 }
 0x155   :  { %564 = vst [vmem:[#allocation10 + $0x48] sm:$0xff] %v540_v7  ;;  %v463_v12 = vadd.f32 %v796_v10, %v728_v8  ;;  %v457_v13 = vpop.f32.mrb[11].mxu0 }
 0x156   :  { %563 = vst [vmem:[#allocation10 + $0x40] sm:$0xff] %v539_v9  ;;  %v458_v14 = vadd.f32 %v457_v13, %v272_v11 }
 0x157   :  { %v542_v15 = vadd.f32 %v1142_v34, %v463_v12  ;;  %v731_v16 = vpop.f32.mrb[12].mxu1 }
 0x158   :  { %v541_v17 = vadd.f32 %v1142_v34, %v458_v14  ;;  %v799_v18 = vpop.f32.mrb[12].mxu0  ;;  %v282_v19 = vpop.f32.mrb[13].mxu1 }
 0x159   :  { %566 = vst [vmem:[#allocation10 + $0x58] sm:$0xff] %v542_v15  ;;  %v473_v20 = vadd.f32 %v799_v18, %v731_v16  ;;  %v467_v21 = vpop.f32.mrb[13].mxu0 }
 0x15a   :  { %565 = vst [vmem:[#allocation10 + $0x50] sm:$0xff] %v541_v17  ;;  %v468_v22 = vadd.f32 %v467_v21, %v282_v19 }
 0x15b   :  { %v544_v23 = vadd.f32 %v1142_v34, %v473_v20  ;;  %v734_v24 = vpop.f32.mrb[14].mxu1 }
 0x15c   :  { %v543_v25 = vadd.f32 %v1142_v34, %v468_v22  ;;  %v802_v26 = vpop.f32.mrb[14].mxu0  ;;  %v292_v27 = vpop.f32.mrb[15].mxu1 }
 0x15d   :  { %568 = vst [vmem:[#allocation10 + $0x68] sm:$0xff] %v544_v23  ;;  %v483_v28 = vadd.f32 %v802_v26, %v734_v24  ;;  %v477_v29 = vpop.f32.mrb[15].mxu0 }
 0x15e   :  { %567 = vst [vmem:[#allocation10 + $0x60] sm:$0xff] %v543_v25  ;;  %v478_v30 = vadd.f32 %v477_v29, %v292_v27 }
 0x15f   :  { %v546_v31 = vadd.f32 %v1142_v34, %v483_v28  ;;  %v737_v32 = vpop.f32.mrb[16].mxu1 }
 0x160   :  { %v545_v33 = vadd.f32 %v1142_v34, %v478_v30  ;;  %v805_v35 = vpop.f32.mrb[16].mxu0  ;;  %v302_v36 = vpop.f32.mrb[17].mxu1 }
 0x161   :  { %570 = vst [vmem:[#allocation10 + $0x78] sm:$0xff] %v546_v31  ;;  %v493_v37 = vadd.f32 %v805_v35, %v737_v32  ;;  %v487_v38 = vpop.f32.mrb[17].mxu0 }
 0x162   :  { %569 = vst [vmem:[#allocation10 + $0x70] sm:$0xff] %v545_v33  ;;  %v488_v39 = vadd.f32 %v487_v38, %v302_v36 }
 0x163   :  { %v548_v40 = vadd.f32 %v1142_v34, %v493_v37  ;;  %v740_v41 = vpop.f32.mrb[18].mxu1 }
 0x164   :  { %v547_v42 = vadd.f32 %v1142_v34, %v488_v39  ;;  %v808_v43 = vpop.f32.mrb[18].mxu0  ;;  %v312_v44 = vpop.f32.mrb[19].mxu1 }
 0x165   :  { %572 = vst [vmem:[#allocation10 + $0x88] sm:$0xff] %v548_v40  ;;  %v503_v45 = vadd.f32 %v808_v43, %v740_v41  ;;  %v497_v46 = vpop.f32.mrb[19].mxu0 }
 0x166   :  { %571 = vst [vmem:[#allocation10 + $0x80] sm:$0xff] %v547_v42  ;;  %v498_v47 = vadd.f32 %v497_v46, %v312_v44 }
 0x167   :  { %v550_v48 = vadd.f32 %v1142_v34, %v503_v45  ;;  %v743_v49 = vpop.f32.mrb[20].mxu1 }
 0x168   :  { %v549_v50 = vadd.f32 %v1142_v34, %v498_v47  ;;  %v811_v51 = vpop.f32.mrb[20].mxu0  ;;  %v322_v52 = vpop.f32.mrb[21].mxu1 }
 0x169   :  { %574 = vst [vmem:[#allocation10 + $0x98] sm:$0xff] %v550_v48  ;;  %v513_v53 = vadd.f32 %v811_v51, %v743_v49  ;;  %v507_v54 = vpop.f32.mrb[21].mxu0 }
 0x16a   :  { %573 = vst [vmem:[#allocation10 + $0x90] sm:$0xff] %v549_v50  ;;  %v508_v55 = vadd.f32 %v507_v54, %v322_v52 }
 0x16b   :  { %v552_v56 = vadd.f32 %v1142_v34, %v513_v53  ;;  %v746_v57 = vpop.f32.mrb[22].mxu1 }
 0x16c   :  { %v551_v58 = vadd.f32 %v1142_v34, %v508_v55  ;;  %v814_v59 = vpop.f32.mrb[22].mxu0  ;;  %v332_v60 = vpop.f32.mrb[23].mxu1 }
 0x16d   :  { %576 = vst [vmem:[#allocation10 + $0xa8] sm:$0xff] %v552_v56  ;;  %v523_v61 = vadd.f32 %v814_v59, %v746_v57  ;;  %v517_v62 = vpop.f32.mrb[23].mxu0 }
 0x16e   :  { %575 = vst [vmem:[#allocation10 + $0xa0] sm:$0xff] %v551_v58  ;;  %v518_v63 = vadd.f32 %v517_v62, %v332_v60 }
 0x16f   :  { %v554_v0 = vadd.f32 %v1142_v34, %v523_v61 }
 0x170   :  { %v553_v1 = vadd.f32 %v1142_v34, %v518_v63 }
 0x171   :  { %578 = vst [vmem:[#allocation10 + $0xb8] sm:$0xff] %v554_v0 }
 0x172   :  { %577 = vst [vmem:[#allocation10 + $0xb0] sm:$0xff] %v553_v1 }
 0x173   :  { %1009 = shalt.err (!%p1006_p8)
}
 0x174   :  { %s1010_s22 = scalar_lea.hbm %s1188_s5, 3072 }
 0x175   :  { %p1011_p9 = scmp.ne.s32.totalorder %s1188_s5, %s1010_s22  ;;  %p1014_p10 = scmp.lt.u32.totalorder %s1010_s22, %s1188_s5 }
 0x177   :  { %p1016_p11 = pnand %p1014_p10, %p1011_p9 }
 0x179   :  { %1019 = shalt.err (!%p1016_p11)
}
 0x17a   :  { %590 = dma.vmem_to_hbm [thread:$0]  %s585_s17, 3072, %s1188_s5, [#allocation4], %s1030_s30, %s1030_s30, %s1031_s6  }
 0x17b   :  { %1026 = dma.done.wait [#allocation4], 3072  }
 0x17c   :  { %1027 = vsyncadd [#allocation4], 4294964224 }
 0x17d   :  { %594 = vsyncpa [#allocation3], 1 }
 0x17e   :  { %595 = vsyncpa [#allocation6], 1 }
 0x17f   :  { %596 = vsyncpa [#allocation9], 1 }
 0x180   :  { %597 = vsyncpa [#allocation4], 1 }

</bundles_post_ra>
